<compile_context>
chip_gen: v7x
topology: tpu7x:2x2x1
jax: 0.10.0
libtpu: 0.0.40
codegen_flags: <defaults>
</compile_context>

<pallas_src>
import functools

import jax
import jax.numpy as jnp
from jax import lax
from jax.experimental import pallas as pl
from jax.experimental.pallas import tpu as pltpu

LN_EPS = 1e-5  # torch.nn.LayerNorm default


def _round_up(x, m):
    return ((x + m - 1) // m) * m


def _vmem_cap_bytes():
    """~80% of physical VMEM (v5e/v6e: 128 MiB, v7x: 64 MiB); safe fallback."""
    try:
        info = pltpu.get_tpu_info()
        cap = int(getattr(info, "vmem_capacity_bytes", 0) or 0)
        if cap > 0:
            return int(cap * 0.8)
    except Exception:
        pass
    return 48 * 1024 * 1024


def _pick_tk(H):
    """Contraction-tile size for the K-tiled path (multiple of 128)."""
    for cand in (512, 256, 128):
        if cand < H and H % cand == 0:
            return cand
    return H


def _layernorm_epilogue(h, g_ref, beta_ref, o_ref):
    # Single-pass variance: var = E[h^2] - E[h]^2 (one fewer (bt,H) f32 pass).
    mean = jnp.mean(h, axis=-1, keepdims=True)
    mean_sq = jnp.mean(h * h, axis=-1, keepdims=True)
    inv = lax.rsqrt(mean_sq - mean * mean + LN_EPS)
    scale = inv * g_ref[...].astype(jnp.float32)
    o_ref[...] = ((h - mean) * scale
                  + beta_ref[...].astype(jnp.float32)).astype(o_ref.dtype)


# ---------------------------------------------------------------------------
# Path A: full (pre-transposed) weight resident in VMEM, 1-D token grid.
# ---------------------------------------------------------------------------
def _fused_kernel(x_ref, res_ref, wt_ref, b_ref, g_ref, beta_ref, o_ref):
    # x_ref:   (bt, H)  tile of hidden_states
    # res_ref: (bt, H)  tile of residual
    # wt_ref:  (H, H)   weight, already (in, out) -> plain jnp.dot, no relayout
    # b/g/beta:(1, H)
    h = jnp.dot(x_ref[...], wt_ref[...], preferred_element_type=jnp.float32)
    h = h + b_ref[...].astype(jnp.float32) + res_ref[...].astype(jnp.float32)
    # Dropout: identity in inference mode.
    # TODO(synk): training-mode dropout (pltpu.prng_random_bits mask) not emitted.
    _layernorm_epilogue(h, g_ref, beta_ref, o_ref)


# ---------------------------------------------------------------------------
# Path B: K-tiled contraction (large H / forced). Grid = (token_tiles, k_tiles).
# ---------------------------------------------------------------------------
def _ktiled_kernel(x_ref, res_ref, wt_ref, b_ref, g_ref, beta_ref, o_ref,
                   acc_ref):
    k = pl.program_id(1)

    @pl.when(k == 0)
    def _():
        acc_ref[...] = jnp.zeros_like(acc_ref)

    acc_ref[...] += jnp.dot(x_ref[...], wt_ref[...],
                            preferred_element_type=jnp.float32)

    @pl.when(k == pl.num_programs(1) - 1)
    def _():
        h = (acc_ref[...]
             + b_ref[...].astype(jnp.float32)
             + res_ref[...].astype(jnp.float32))
        _layernorm_epilogue(h, g_ref, beta_ref, o_ref)


@functools.partial(jax.jit, static_argnames=("block_tokens", "force_k_tiling"))
def attention_output(hidden_states, input_tensor, w, b, gamma, beta,
                     block_tokens=512, force_k_tiling=False):
    """Fused Linear + dropout(eval) + residual + LayerNorm.

    hidden_states, input_tensor: [B, S, H]
    w: [H_out, H_in]   (torch nn.Linear layout)
    b, gamma, beta: [H]
    """
    B, S, H = hidden_states.shape
    tokens = B * S

    x2 = hidden_states.reshape(tokens, H)
    r2 = input_tensor.reshape(tokens, H)
    b2 = b.reshape(1, H)
    g2 = gamma.reshape(1, H)
    beta2 = beta.reshape(1, H)
    # One-time transpose (static weight): kernel contracts lhs dim 1 / rhs dim 0.
    wt = w.T

    itemsize = jnp.dtype(hidden_states.dtype).itemsize
    w_isz = jnp.dtype(w.dtype).itemsize

    # Token tile: packed-sublane aligned (f32:8 / bf16:16 / int8:32); prefer
    # MXU-friendly 128-row multiples when there are enough tokens.
    sub = 8 * max(1, 4 // itemsize)
    align = 128 if tokens >= 512 else sub
    bt = max(align, min(int(block_tokens), _round_up(tokens, align)))
    bt = _round_up(bt, align)
    n_tok_tiles = pl.cdiv(tokens, bt)   # no pad: OOB tail rows are row-wise
                                        # garbage whose stores are discarded.

    vmem_cap = _vmem_cap_bytes()
    use_ktiled = bool(force_k_tiling) or (
        H % 128 == 0 and H * H * w_isz > 0.4 * vmem_cap)

    if use_ktiled:
        tk = _pick_tk(H)
        vmem_est = (2 * bt * tk * itemsize        # x tiles (double-buffered)
                    + 2 * bt * H * itemsize       # residual tiles
                    + 2 * bt * H * itemsize       # output tiles
                    + 2 * tk * H * w_isz          # weight K-tiles
                    + 3 * H * 4                   # bias / gamma / beta
                    + bt * H * 4                  # f32 accumulator scratch
                    + 2 * bt * H * 4)             # f32 intermediates headroom
    else:
        tk = H
        vmem_est = (4 * bt * H * itemsize         # x + residual (double-buffered)
                    + 2 * bt * H * itemsize       # output tiles
                    + H * H * w_isz               # weight, single buffer
                    + 3 * H * 4
                    + 3 * bt * H * 4)
    vmem_limit = int(min(vmem_cap, max(8 * 1024 * 1024,
                                       vmem_est + 2 * 1024 * 1024)))

    cost = pl.CostEstimate(
        flops=int(2 * tokens * H * H + 8 * tokens * H),
        transcendentals=int(tokens),
        bytes_accessed=int(tokens * H * 3 * itemsize + H * H * w_isz
                           + 3 * H * jnp.dtype(b.dtype).itemsize),
    )

    out_shape = jax.ShapeDtypeStruct((tokens, H), hidden_states.dtype)

    if not use_ktiled:
        def _const(shape):
            return pl.BlockSpec(shape, lambda i: (0, 0),
                                pipeline_mode=pl.Buffered(1))

        out2 = pl.pallas_call(
            _fused_kernel,
            out_shape=out_shape,
            grid_spec=pltpu.PrefetchScalarGridSpec(
                num_scalar_prefetch=0,
                grid=(n_tok_tiles,),
                in_specs=[
                    pl.BlockSpec((bt, H), lambda i: (i, 0)),   # x tile
                    pl.BlockSpec((bt, H), lambda i: (i, 0)),   # residual tile
                    _const((H, H)),                            # W^T (in, out)
                    _const((1, H)),                            # bias
                    _const((1, H)),                            # gamma
                    _const((1, H)),                            # beta
                ],
                out_specs=pl.BlockSpec((bt, H), lambda i: (i, 0)),
            ),
            compiler_params=pltpu.CompilerParams(
                dimension_semantics=("parallel",),
                vmem_limit_bytes=vmem_limit,
            ),
            cost_estimate=cost,
        )(x2, r2, wt, b2, g2, beta2)
    else:
        n_k = H // tk

        def _const(shape):
            return pl.BlockSpec(shape, lambda i, k: (0, 0),
                                pipeline_mode=pl.Buffered(1))

        out2 = pl.pallas_call(
            _ktiled_kernel,
            out_shape=out_shape,
            grid_spec=pltpu.PrefetchScalarGridSpec(
                num_scalar_prefetch=0,
                grid=(n_tok_tiles, n_k),
                in_specs=[
                    pl.BlockSpec((bt, tk), lambda i, k: (i, k)),  # x K-tile
                    pl.BlockSpec((bt, H), lambda i, k: (i, 0)),   # residual
                    pl.BlockSpec((tk, H), lambda i, k: (k, 0)),   # W^T K-tile
                    _const((1, H)),                               # bias
                    _const((1, H)),                               # gamma
                    _const((1, H)),                               # beta
                ],
                out_specs=pl.BlockSpec((bt, H), lambda i, k: (i, 0)),
                scratch_shapes=[pltpu.VMEM((bt, H), jnp.float32)],
            ),
            compiler_params=pltpu.CompilerParams(
                dimension_semantics=("parallel", "arbitrary"),
                vmem_limit_bytes=vmem_limit,
            ),
            cost_estimate=cost,
        )(x2, r2, wt, b2, g2, beta2)

    return out2.reshape(B, S, H)


def _reference(hidden_states, input_tensor, w, b, gamma, beta):
    hs = hidden_states.astype(jnp.float32)
    it = input_tensor.astype(jnp.float32)
    wf = w.astype(jnp.float32)
    bf = b.astype(jnp.float32)
    h = jnp.einsum("bsh,oh->bso", hs, wf) + bf
    h = h + it
    mean = jnp.mean(h, axis=-1, keepdims=True)
    var = jnp.mean((h - mean) ** 2, axis=-1, keepdims=True)
    return (h - mean) * lax.rsqrt(var + LN_EPS) * gamma.astype(jnp.float32) \
        + beta.astype(jnp.float32)


def _make_params(key, H, dtype=jnp.float32):
    k3, k4 = jax.random.split(key)
    bound = 1.0 / (H ** 0.5)
    w = jax.random.uniform(k3, (H, H), jnp.float32, -bound, bound).astype(dtype)
    b = jax.random.uniform(k4, (H,), jnp.float32, -bound, bound).astype(dtype)
    gamma = jnp.ones((H,), dtype)
    beta = jnp.zeros((H,), dtype)
    return w, b, gamma, beta


if __name__ == "__main__":
    B, S, H = 2, 8, 32
    key = jax.random.PRNGKey(0)
    k1, k2, kp, k5, k6 = jax.random.split(key, 5)

    hidden_states = jax.random.normal(k1, (B, S, H), dtype=jnp.float32)
    input_tensor = jax.random.normal(k2, (B, S, H), dtype=jnp.float32)
    w, b, gamma, beta = _make_params(kp, H)

    # 1) f32, multi-step grid (block_tokens=8 -> grid of 2) exercises pipelining.
    out = attention_output(hidden_states, input_tensor, w, b, gamma, beta,
                           block_tokens=8)
    out = jax.block_until_ready(out)
    ref = _reference(hidden_states, input_tensor, w, b, gamma, beta)
    assert out.shape == (B, S, H)
    assert jnp.allclose(out, ref, atol=1e-4, rtol=1e-4), "f32 mismatch vs reference"

    # 2) ragged token count (B*S not a multiple of the tile) -> no-pad,
    #    partial last block with discarded OOB stores.
    hs_r = jax.random.normal(k5, (B, 5, H), dtype=jnp.float32)
    it_r = hs_r[::-1]
    out_r = jax.block_until_ready(
        attention_output(hs_r, it_r, w, b, gamma, beta, block_tokens=8))
    ref_r = _reference(hs_r, it_r, w, b, gamma, beta)
    assert out_r.shape == (B, 5, H)
    assert jnp.allclose(out_r, ref_r, atol=1e-4, rtol=1e-4), "ragged mismatch"

    # 3) bf16 inputs/params: native bf16 operands on the MXU, f32 accumulation,
    #    token tile rounds up to the bf16 packed sublane multiple (16).
    hs16 = hidden_states.astype(jnp.bfloat16)
    it16 = input_tensor.astype(jnp.bfloat16)
    out16 = jax.block_until_ready(
        attention_output(hs16, it16, w.astype(jnp.bfloat16),
                         b.astype(jnp.bfloat16), gamma.astype(jnp.bfloat16),
                         beta.astype(jnp.bfloat16), block_tokens=8))
    ref16 = _reference(hs16, it16, w.astype(jnp.bfloat16),
                       b.astype(jnp.bfloat16), gamma.astype(jnp.bfloat16),
                       beta.astype(jnp.bfloat16))
    assert jnp.allclose(out16.astype(jnp.float32), ref16, atol=1e-1), "bf16 mismatch"

    # 4) K-tiled contraction path (forced) at H=256 -> grid (2 token tiles, 2 K tiles),
    #    f32 accumulator scratch + pl.when epilogue.
    Hk = 256
    hs_k = jax.random.normal(k6, (B, S, Hk), dtype=jnp.float32)
    it_k = hs_k[::-1]
    wk, bk, gk, bek = _make_params(kp, Hk)
    out_k = jax.block_until_ready(
        attention_output(hs_k, it_k, wk, bk, gk, bek,
                         block_tokens=8, force_k_tiling=True))
    ref_k = _reference(hs_k, it_k, wk, bk, gk, bek)
    assert out_k.shape == (B, S, Hk)
    assert jnp.allclose(out_k, ref_k, atol=1e-4, rtol=1e-4), "k-tiled mismatch"

    print("KERNEL_OK")
</pallas_src>

<mosaic_0001>
module attributes {stable_mosaic.version = 11 : i64} {
  func.func @_fused_kernel(%arg0: i32, %arg1: memref<8x32xf32, #tpu.memory_space<vmem>>, %arg2: memref<8x32xf32, #tpu.memory_space<vmem>>, %arg3: memref<32x32xf32, #tpu.memory_space<vmem>>, %arg4: memref<1x32xf32, #tpu.memory_space<vmem>>, %arg5: memref<1x32xf32, #tpu.memory_space<vmem>>, %arg6: memref<1x32xf32, #tpu.memory_space<vmem>>, %arg7: memref<8x32xf32, #tpu.memory_space<vmem>>) attributes {dimension_semantics = [#tpu.dimension_semantics<parallel>], iteration_bounds = array<i64: 2>, scalar_prefetch = 0 : i64, scratch_operands = 0 : i64, tpu.core_type = #tpu.core_type<tc>, window_params = [{transform_indices = @transform_0, window_bounds = array<i64: 8, 32>}, {transform_indices = @transform_1, window_bounds = array<i64: 8, 32>}, {pipeline_mode = #tpu.pipeline_mode<synchronous>, transform_indices = @transform_2, window_bounds = array<i64: 32, 32>}, {pipeline_mode = #tpu.pipeline_mode<synchronous>, transform_indices = @transform_3, window_bounds = array<i64: 1, 32>}, {pipeline_mode = #tpu.pipeline_mode<synchronous>, transform_indices = @transform_4, window_bounds = array<i64: 1, 32>}, {pipeline_mode = #tpu.pipeline_mode<synchronous>, transform_indices = @transform_5, window_bounds = array<i64: 1, 32>}, {transform_indices = @transform_6, window_bounds = array<i64: 8, 32>}]} {
    %c0 = arith.constant 0 : index
    %c0_0 = arith.constant 0 : index
    %0 = vector.load %arg1[%c0, %c0_0] : memref<8x32xf32, #tpu.memory_space<vmem>>, vector<8x32xf32>
    %c0_1 = arith.constant 0 : index
    %c0_2 = arith.constant 0 : index
    %1 = vector.load %arg3[%c0_1, %c0_2] : memref<32x32xf32, #tpu.memory_space<vmem>>, vector<32x32xf32>
    %cst = arith.constant dense<0.000000e+00> : vector<8x32xf32>
    %2 = tpu.matmul %0, %1, %cst {dimension_numbers = #tpu.dot_dimension_numbers<[1], [0], [0], [1], [0, 0, 1, 1], [], []>} : vector<8x32xf32>, vector<32x32xf32>, vector<8x32xf32> -> vector<8x32xf32>
    %c0_3 = arith.constant 0 : index
    %c0_4 = arith.constant 0 : index
    %3 = vector.load %arg4[%c0_3, %c0_4] : memref<1x32xf32, #tpu.memory_space<vmem>>, vector<1x32xf32>
    %4 = vector.broadcast %3 : vector<1x32xf32> to vector<8x32xf32>
    %5 = arith.addf %2, %4 : vector<8x32xf32>
    %c0_5 = arith.constant 0 : index
    %c0_6 = arith.constant 0 : index
    %6 = vector.load %arg2[%c0_5, %c0_6] : memref<8x32xf32, #tpu.memory_space<vmem>>, vector<8x32xf32>
    %7 = arith.addf %5, %6 : vector<8x32xf32>
    %cst_7 = arith.constant dense<0.000000e+00> : vector<8xf32>
    %8 = vector.multi_reduction <add>, %7, %cst_7 [1] : vector<8x32xf32> to vector<8xf32>
    %9 = vector.shape_cast %8 : vector<8xf32> to vector<8x1xf32>
    %cst_8 = arith.constant 3.200000e+01 : f32
    %10 = vector.broadcast %cst_8 : f32 to vector<8x1xf32>
    %11 = arith.divf %9, %10 : vector<8x1xf32>
    %12 = arith.mulf %7, %7 : vector<8x32xf32>
    %cst_9 = arith.constant dense<0.000000e+00> : vector<8xf32>
    %13 = vector.multi_reduction <add>, %12, %cst_9 [1] : vector<8x32xf32> to vector<8xf32>
    %14 = vector.shape_cast %13 : vector<8xf32> to vector<8x1xf32>
    %cst_10 = arith.constant 3.200000e+01 : f32
    %15 = vector.broadcast %cst_10 : f32 to vector<8x1xf32>
    %16 = arith.divf %14, %15 : vector<8x1xf32>
    %17 = arith.mulf %11, %11 : vector<8x1xf32>
    %18 = arith.subf %16, %17 : vector<8x1xf32>
    %cst_11 = arith.constant 9.99999974E-6 : f32
    %19 = vector.broadcast %cst_11 : f32 to vector<8x1xf32>
    %20 = arith.addf %18, %19 : vector<8x1xf32>
    %21 = math.rsqrt %20 : vector<8x1xf32>
    %c0_12 = arith.constant 0 : index
    %c0_13 = arith.constant 0 : index
    %22 = vector.load %arg5[%c0_12, %c0_13] : memref<1x32xf32, #tpu.memory_space<vmem>>, vector<1x32xf32>
    %23 = vector.broadcast %21 : vector<8x1xf32> to vector<8x32xf32>
    %24 = vector.broadcast %22 : vector<1x32xf32> to vector<8x32xf32>
    %25 = arith.mulf %23, %24 : vector<8x32xf32>
    %26 = vector.broadcast %11 : vector<8x1xf32> to vector<8x32xf32>
    %27 = arith.subf %7, %26 : vector<8x32xf32>
    %28 = arith.mulf %27, %25 : vector<8x32xf32>
    %c0_14 = arith.constant 0 : index
    %c0_15 = arith.constant 0 : index
    %29 = vector.load %arg6[%c0_14, %c0_15] : memref<1x32xf32, #tpu.memory_space<vmem>>, vector<1x32xf32>
    %30 = vector.broadcast %29 : vector<1x32xf32> to vector<8x32xf32>
    %31 = arith.addf %28, %30 : vector<8x32xf32>
    %c0_16 = arith.constant 0 : index
    %c0_17 = arith.constant 0 : index
    %32 = vector.load %arg7[%c0_16, %c0_17] : memref<8x32xf32, #tpu.memory_space<vmem>>, vector<8x32xf32>
    tpu.vector_store %arg7[%c0_16, %c0_17], %31 {strides = array<i32>} : memref<8x32xf32, #tpu.memory_space<vmem>>, vector<8x32xf32>,
    return
  }
  func.func @transform_0(%arg0: i32) -> (i32, i32) {
    %c0_i32 = arith.constant 0 : i32
    %c0_i32_0 = arith.constant 0 : i32
    return %arg0, %c0_i32 : i32, i32
  }
  func.func @transform_1(%arg0: i32) -> (i32, i32) {
    %c0_i32 = arith.constant 0 : i32
    %c0_i32_0 = arith.constant 0 : i32
    return %arg0, %c0_i32 : i32, i32
  }
  func.func @transform_2(%arg0: i32) -> (i32, i32) {
    %c0_i32 = arith.constant 0 : i32
    %c0_i32_0 = arith.constant 0 : i32
    %c0_i32_1 = arith.constant 0 : i32
    return %c0_i32, %c0_i32_0 : i32, i32
  }
  func.func @transform_3(%arg0: i32) -> (i32, i32) {
    %c0_i32 = arith.constant 0 : i32
    %c0_i32_0 = arith.constant 0 : i32
    %c0_i32_1 = arith.constant 0 : i32
    return %c0_i32, %c0_i32_0 : i32, i32
  }
  func.func @transform_4(%arg0: i32) -> (i32, i32) {
    %c0_i32 = arith.constant 0 : i32
    %c0_i32_0 = arith.constant 0 : i32
    %c0_i32_1 = arith.constant 0 : i32
    return %c0_i32, %c0_i32_0 : i32, i32
  }
  func.func @transform_5(%arg0: i32) -> (i32, i32) {
    %c0_i32 = arith.constant 0 : i32
    %c0_i32_0 = arith.constant 0 : i32
    %c0_i32_1 = arith.constant 0 : i32
    return %c0_i32, %c0_i32_0 : i32, i32
  }
  func.func @transform_6(%arg0: i32) -> (i32, i32) {
    %c0_i32 = arith.constant 0 : i32
    %c0_i32_0 = arith.constant 0 : i32
    return %arg0, %c0_i32 : i32, i32
  }
}

</mosaic_0001>

<bundles_post_ra>
// kernel: attention_output.1
= control target key start
LH: loop header
LB: loop body
LE: loop exit
PB: predicated region body
PF: predicated region fallthrough
CT: control target
= control target key end

     0   :  { %11 = vsyncpa [#allocation3], 0  ;;  %s782_s0 = inlined_call_operand.vmem [shape: f32[16,32], index: 0, kind: input, shape index: {}]   ;;  %s783_s1 = inlined_call_operand.vmem [shape: f32[16,32], index: 1, kind: input, shape index: {}]   ;;  %s784_s2 = inlined_call_operand.vmem [shape: f32[32,32], index: 2, kind: input, shape index: {}]   ;;  %s785_s3 = inlined_call_operand.vmem [shape: f32[1,32], index: 3, kind: input, shape index: {}]   ;;  %s786_s4 = inlined_call_operand.vmem [shape: f32[1,32], index: 4, kind: input, shape index: {}]   ;;  %s787_s5 = inlined_call_operand.vmem [shape: f32[1,32], index: 5, kind: input, shape index: {}]   ;;  %s788_s6 = inlined_call_operand.hbm [shape: f32[16,32], index: 6, kind: output, shape index: {}]  }
   0x1   :  { %13 = vsyncpa [#allocation3 + $0x1], 0  ;;  %s654_s21 = smov 0   ;;  %s656_s22 = smov 0  }
   0x2   :  { %s658_s23 = smov 0   ;;  %s660_s24 = smov 0  }
   0x3 LB: > { %s675_s25 = sadd.s32 4294967295, %s613_s24   ;;  %s470_s26 = sadd.s32 4294967294, %s613_s24   ;;  %s613_s24 = sphi %s660_s24, %s794_s24   ;;  %s609_s23 = sphi %s658_s23, %s793_s23   ;;  %s605_s22 = sphi %s656_s22, %s792_s22   ;;  %s601_s21 = sphi %s654_s21, %s791_s21  }
   0x4   : > { %s679_s27 = sadd.s32 1, %s613_s24   ;;  %s162_s28 = sadd.s32 1, %s609_s23 }
   0x5   : > { %s159_s29 = ssub.s32 %s613_s24, %s679_s27  ;;  %p172_p0 = scmp.ne.s32.totalorder %s609_s23, %s605_s22 }
   0x6   : > { %p160_p1 = scmp.eq.s32.totalorder %s159_s29, 0  ;;  %p173_p2 = scmp.eq.s32.totalorder %s675_s25, 1 }
   0x7   : > { %p178_p3 = scmp.ne.s32.totalorder %s605_s22, %s601_s21  ;;  %p179_p4 = scmp.eq.s32.totalorder %s470_s26, 1 }
   0x8   : > { %s690_s30 = scalar_select %p160_p1, %s609_s23, %s162_s28  }
   0x9   : > { %p692_p5 = por %p173_p2, %p172_p0  ;;  %p696_p6 = por %p179_p4, %p178_p3 }
   0xa   : > { %p473_p7 = scmp.ge.s32.totalorder %s613_s24, 1  ;;  %p223_p8 = scmp.lt.s32.totalorder %s613_s24, 3 }
   0xc   : > { %p224_p9 = pnand %p473_p7, %p223_p8 }
   0xd   : > { %v265_v0 = vld [vmem:[%s784_s2] sm:$0xff] (!%p224_p9)  ;;  %v266_v1 = vld [vmem:[%s784_s2 + $0x8] sm:$0xff] (!%p224_p9)  ;;  %v267_v2 = vld [vmem:[%s784_s2 + $0x10] sm:$0xff] (!%p224_p9)  ;;  %v615_v3 = vmov (!%p224_p9), 0.0|0.0   ;;  %vm616_vm0 = vmmov (!%p224_p9), 0   ;;  %v617_v6 = vmov (!%p224_p9), 0.0  }
   0xe   : > { %227 = sbr.rel (%p224_p9) target bundleno = 426 (0x1aa), region = 44  ;;  %501 = vmatprep.subr.bf16.mxu0 (!%p224_p9), %v615_v3  ;;  %v502_v4 = vpack.c.bf16 (!%p224_p9), %v266_v1, %v265_v0  ;;  %v268_v5 = vld [vmem:[%s784_s2 + $0x18] sm:$0xff] (!%p224_p9)  ;;  %498 = vmatprep.mubr.msk.f32.mxu0 (!%p224_p9), %vm616_vm0, %v617_v6  ;;  %p256_p10 = scmp.lt.s32.totalorder (!%p224_p9), %s675_s25, 1  ;;  %vm276_vm1 = vcmask (!%p224_p9), 261120   ;;  %v477_v9 = vld [vmem:[%s785_s3] ss:$0 sm:$0xff] (!%p224_p9) }
   0xf   : > { %v505_v7 = vpack.c.bf16 (!%p224_p9), %v268_v5, %v267_v2  ;;  %s253_s12 = sand.u32 (!%p224_p9), 1, %s605_s22   ;;  %v479_v25 = vld [vmem:[%s786_s4] ss:$0 sm:$0xff] (!%p224_p9) }
  0x10   : > { %503 = vmatpush3.bf16.msra.mxu0 (!%p224_p9), %v502_v4  ;;  %s474_s13 = sshll.u32 (!%p224_p9), %s253_s12, 3  ;;  %v480_v29 = vld [vmem:[%s787_s5] ss:$0 sm:$0xff] (!%p224_p9) }
  0x11   : > { %504 = vmatprep.subr.bf16.mxu0 (!%p224_p9), %v615_v3  ;;  %s255_s19 = scalar_lea.vmem (!%p224_p9), [#allocation2], %s474_s13 }
  0x12   : > { %s399_s20 = sshll.u32 (!%p224_p9), %s255_s19, 4  ;;  %s741_s20 = int_to_ptr.vmem [resolvable:$true] %s399_s20 }
  0x13   : > { %s551_s10 = scalar_lea.vmem (!%p224_p9), %s741_s20, 128 }
  0x14   : > { %506 = vmatpush3.bf16.msra.mxu0 (!%p224_p9), %v505_v7  ;;  %p552_p11 = scmp.ne.s32.totalorder (!%p224_p9), %s741_s20, %s551_s10 }
  0x15   : > { %s257_s17 = scalar_select %p256_p10, %s675_s25, 1 }
  0x16   : > { %p553_p12 = pnand %p552_p11, %p692_p5 }
  0x17   : > { %s475_s18 = sshll.u32 %s257_s17, 3 }
  0x18   : > { %s259_s26 = scalar_lea.vmem %s782_s0, %s475_s18  ;;  %s263_s9 = scalar_lea.vmem %s783_s1, %s475_s18 }
  0x19   : > { %v264_v8 = vld [vmem:[%s259_s26] sm:$0xff]  ;;  %s482_s18 = sshll.u32 %s675_s25, 7  ;;  %p554_p13 = pneg %p553_p12 }
  0x1a   : > { %499 = vmatmul.mubr.msk.f32.vlgmr.msra.gmra.mrb[0].mxu0 %vm276_vm1, %v264_v8  ;;  %v350_v11 = vld [vmem:[%s263_s9] sm:$0xff]  ;;  %s739_s29 = scalar_lea.hbm %s788_s6, %s482_s18  ;;  %s386_s9 = scalar_lea.sflag [#allocation3], %s253_s12 }
  0x1b   : > { %s618_s25 = smov [#allocation2]  }
  0x1c   : > { %s555_s11 = sshll.u32 %s618_s25, 4  ;;  %s556_s11 = int_to_ptr.vmem [resolvable:$false] %s555_s11 }
  0x1d   : > { %s557_s13 = scalar_lea.vmem %s556_s11, 256  ;;  %p558_p0 = scmp.lt.s32.totalorder %s741_s20, %s556_s11 }
  0x1e   : > { %p559_p1 = scmp.lt.s32.totalorder %s557_s13, %s551_s10 }
  0x20   : > { %p560_p2 = por %p559_p1, %p558_p0 }
  0x22   : > { %p561_p3 = pnand %p560_p2, %p554_p13 }
  0xed   : > { %v346_v10 = vpop.f32.mrb[0].mxu0 }
  0xee   : > { %v347_v12 = vadd.f32 %v477_v9, %v346_v10  ;;  %v500_v13 = vpop.f32.mrb[1].mxu0 }
  0xf0   : > { %v351_v14 = vadd.f32 %v350_v11, %v347_v12 }
  0xf2   : > { %v352_v15 = vsel %vm276_vm1, %v351_v14, 0.0  ;;  %v357_v16 = vmul.f32 %v351_v14, %v351_v14 }
  0xf3   : > { %353 = vadd.xlane.f32.xlu0 %v352_v15 }
  0xf4   : > { %v358_v17 = vsel %vm276_vm1, %v357_v16, 0.0 }
  0xf7   : > { %359 = vadd.xlane.f32.xlu0 %v358_v17 }
 0x180   : > { %v354_v18 = vpop.xlane.xlu0 %353 }
 0x181   : > { %v356_v19 = vmul.f32 0.03125, %v354_v18 }
 0x183   : > { %v362_v21 = vmul.f32 %v356_v19, %v356_v19  ;;  %v374_v27 = vsub.f32 %v351_v14, %v356_v19 }
 0x184   : > { %v360_v20 = vpop.xlane.xlu0 %359 }
 0x185   : > { %v361_v22 = vmul.f32 0.03125, %v360_v20 }
 0x187   : > { %v363_v23 = vsub.f32 %v361_v22, %v362_v21 }
 0x189   : > { %v364_v24 = vadd.f32 1e-05, %v363_v23 }
 0x18b   : > { %549 = vrsqrt.f32 %v364_v24 }
 0x195   : > { %v550_v26 = vpop.eup %549 }
 0x196   : > { %v373_v28 = vmul.f32 %v550_v26, %v479_v25 }
 0x198   : > { %v375_v30 = vmul.f32 %v374_v27, %v373_v28 }
 0x19a   : > { %v383_v31 = vadd.f32 %v480_v29, %v375_v30 }
 0x19c   : > { %384 = vst.msk [vmem:[%s255_s19] sm:$0xff] %vm276_vm1, %v383_v31 }
 0x19d   : > { %564 = shalt.err (!%p561_p3)
}
 0x19e   : > { %s565_s12 = scalar_lea.hbm %s739_s29, 128  ;;  %s569_s16 = scalar_lea.hbm %s788_s6, 256 }
 0x19f   : > { %p566_p4 = scmp.ne.s32.totalorder %s739_s29, %s565_s12  ;;  %p570_p9 = scmp.lt.u32.totalorder %s739_s29, %s788_s6 }
 0x1a0   : > { %p571_p10 = scmp.lt.u32.totalorder %s569_s16, %s565_s12  ;;  %p573_p12 = scmp.lt.u32.totalorder %s565_s12, %s739_s29 }
 0x1a1   : > { %p567_p7 = pnand %p566_p4, %p692_p5 }
 0x1a2   : > { %p572_p11 = por %p571_p10, %p570_p9 }
 0x1a3   : > { %p568_p8 = pneg %p567_p7 }
 0x1a4   : > { %p574_p13 = por %p573_p12, %p572_p11 }
 0x1a6   : > { %p575_p0 = pnand %p574_p13, %p568_p8 }
 0x1a8   : > { %578 = shalt.err (!%p575_p0)
}
 0x1a9   : > { %507 = dma.vmem_to_hbm [thread:$0]  (%p692_p5), %s741_s20, 128, %s739_s29, %s386_s9  }
 0x1aa PF: > { %p513_p1 = scmp.ge.s32.totalorder %s613_s24, 2  ;;  %s411_s19 = sand.u32 1, %s601_s21  }
 0x1ab   : > { %s412_s26 = scalar_lea.sflag [#allocation3], %s411_s19 }
 0x1ac   : > { %p510_p2 = pnand %p513_p1, %p696_p6 }
 0x1ae   : > { %596 = dma.done.wait (!%p510_p2), %s412_s26, 128  }
 0x1af   : > { %598 = vsyncadd (!%p510_p2), %s412_s26, 4294967168  ;;  %p16_p3 = scmp.ge.s32.totalorder %s679_s27, 4   ;;  %s791_s21 = smov %s605_s22 }
 0x1b0   : > { %s792_s22 = smov %s609_s23  ;;  %s793_s23 = smov %s690_s30 }
 0x1b1   : > { %s794_s24 = smov %s679_s27  ;;  %18 = sbr.rel (!%p16_p3) target bundleno = 3 (0x3), region = 82 }
 0x1b8   :  { %417 = vsyncpa [#allocation3], 1 }
 0x1b9   :  { %419 = vsyncpa [#allocation3 + $0x1], 1 }

</bundles_post_ra>
